<compile_context>
chip_gen: v7x
topology: tpu7x:2x2x1
jax: 0.10.0
libtpu: 0.0.40
codegen_flags: <defaults>
</compile_context>

<pallas_src>
import jax
import jax.numpy as jnp
from jax.experimental import pallas as pl
from jax.experimental.pallas import tpu as pltpu


def _round_up(x, m):
    return ((x + m - 1) // m) * m


def _largest_divisor_leq(n, cap):
    cap = max(1, min(n, cap))
    for d in range(cap, 0, -1):
        if n % d == 0:
            return d
    return 1


def _vmem_ceiling_bytes():
    # Generation-aware ceiling: ~3/4 of physical VMEM, i.e. ~96 MiB on
    # v5e/v6e (128 MiB physical) and ~48 MiB on v7x (64 MiB per TensorCore).
    try:
        phys = int(pltpu.get_tpu_info().vmem_capacity_bytes)
    except Exception:
        phys = 64 << 20  # conservative fallback (v7x per-TC size)
    return min(phys * 3 // 4, 100 << 20)


def _mlp_kernel(x_ref, w1t_ref, b1_ref, w2t_ref, b2_ref, o_ref):
    # x:   (Cin, TP)     w1t: (Ch, Cin)    b1: (Ch, 1)   [f32]
    # w2t: (Cout, Ch)    b2:  (Cout, 1)    [f32]          o: (Cout, TP)
    x = x_ref[...]
    h = jnp.dot(w1t_ref[...], x, preferred_element_type=jnp.float32)   # (Ch, TP)
    h = h + b1_ref[...]
    h = jnp.clip(h, 0.0, 6.0)                                          # ReLU6
    # dropout(p=0.0) == identity
    o = jnp.dot(w2t_ref[...], h.astype(w2t_ref.dtype),
                preferred_element_type=jnp.float32)                    # (Cout, TP)
    o = o + b2_ref[...]
    o_ref[...] = o.astype(o_ref.dtype)


def mlp_pallas(x_nchw, w1, b1, w2, b2, *, tile_pixels=None,
               target_step_bytes=2 << 20, max_fold=4):
    """Fused 1x1-conv MLP.

    x_nchw: (N, Cin, H, W)
    w1: (Cin, Ch), b1: (Ch,), w2: (Ch, Cout), b2: (Cout,)
    (1x1 Conv2d weights in matmul form; equivalent to PyTorch
     weight[Cout, Cin, 1, 1] transposed.)
    """
    n, cin, h, w = x_nchw.shape
    ch = w1.shape[1]
    cout = w2.shape[1]
    hw = h * w
    itemsize = jnp.dtype(x_nchw.dtype).itemsize

    vmem_ceiling = _vmem_ceiling_bytes()

    # ---- batch folding (block-diagonal weights) -------------------------
    # If one image's H*W is far below the per-step traffic target, fold `bt`
    # images into the channel axis (free reshape) so each grid step moves
    # more HBM bytes.  Wasted MXU flops scale with bt, so keep bt small.
    io_pixel_bytes = (cin + cout) * itemsize
    target_pixels = max(1, target_step_bytes // io_pixel_bytes)
    wbytes = (cin * ch + ch * cout) * itemsize + (ch + cout) * 4
    bt_cap = min(max_fold, max(1, target_pixels // max(hw, 1)))
    while bt_cap > 1 and bt_cap * bt_cap * wbytes > (2 << 20):
        bt_cap //= 2
    bt = _largest_divisor_leq(n, bt_cap)

    cin_f, ch_f, cout_f = bt * cin, bt * ch, bt * cout

    # ---- pixel-tile selection (VMEM budget + traffic target) ------------
    # VMEM per pixel column: double-buffered in/out tiles + f32 hidden (once).
    per_pixel_vmem = 2 * (cin_f + cout_f) * itemsize + ch_f * 4
    weights_vmem = (ch_f * cin_f + cout_f * ch_f) * itemsize + (ch_f + cout_f) * 4
    budget = max(8 << 20, vmem_ceiling - 2 * weights_vmem - (6 << 20))
    max_tile_p = max(128, (budget // per_pixel_vmem) // 128 * 128)

    if tile_pixels is None:
        tile_pixels = max(4096,
                          target_step_bytes // max(1, (cin_f + cout_f) * itemsize))
    tile_p = min(_round_up(int(tile_pixels), 128), max_tile_p)
    if tile_p >= hw:
        tile_p = hw  # full-extent block (any size allowed when == full dim)

    # ---- guarantee >= 2 parallel grid steps (v7x has 2 TensorCores) -----
    if (n // bt) * pl.cdiv(hw, tile_p) < 2:
        if hw > 128:
            tile_p = _round_up(pl.cdiv(hw, 2), 128)     # < hw -> 2 pixel tiles
        elif n > 1:
            bt = _largest_divisor_leq(n, max(1, bt // 2))
            cin_f, ch_f, cout_f = bt * cin, bt * ch, bt * cout
        # else: single tiny image -- one step is fine.

    # ---- operands (all reshapes are free; no HBM transposes of x) -------
    x_rows = x_nchw.reshape(n, cin, hw)
    w1t = jnp.transpose(w1).astype(x_nchw.dtype)       # (Ch, Cin)
    w2t = jnp.transpose(w2).astype(x_nchw.dtype)       # (Cout, Ch)
    b1c = b1.astype(jnp.float32)
    b2c = b2.astype(jnp.float32)
    if bt > 1:
        eye = jnp.eye(bt, dtype=w1t.dtype)
        w1t = jnp.kron(eye, w1t)                       # (bt*Ch, bt*Cin) block-diag
        w2t = jnp.kron(eye, w2t)                       # (bt*Cout, bt*Ch) block-diag
        b1c = jnp.tile(b1c, bt)
        b2c = jnp.tile(b2c, bt)
        x_rows = x_rows.reshape(n // bt, bt * cin, hw)
    b1c = b1c.reshape(ch_f, 1)
    b2c = b2c.reshape(cout_f, 1)
    nb = x_rows.shape[0]

    grid = (nb, pl.cdiv(hw, tile_p))

    # ---- VMEM limit (no double counting) ---------------------------------
    tile_p_pad = _round_up(tile_p, 128)
    weights_vmem = (ch_f * cin_f + cout_f * ch_f) * itemsize + (ch_f + cout_f) * 4
    io_vmem = 2 * (_round_up(cin_f, 8) + _round_up(cout_f, 8)) * itemsize * tile_p_pad
    hidden_vmem = _round_up(ch_f, 8) * 4 * tile_p_pad
    needed = io_vmem + hidden_vmem + 2 * weights_vmem + (4 << 20)
    vmem_limit = int(min(max(needed, 32 << 20), vmem_ceiling))

    def build_call(single_buffer_weights):
        resident = (dict(pipeline_mode=pl.Buffered(buffer_count=1))
                    if single_buffer_weights else {})
        in_specs = [
            # batch-group dim squeezed; kernel sees (Cin_f, TP)
            pl.BlockSpec((None, cin_f, tile_p), lambda b, i: (b, 0, i)),
            # weights / biases: constant block -> fetched once, resident
            pl.BlockSpec((ch_f, cin_f), lambda b, i: (0, 0), **resident),
            pl.BlockSpec((ch_f, 1), lambda b, i: (0, 0), **resident),
            pl.BlockSpec((cout_f, ch_f), lambda b, i: (0, 0), **resident),
            pl.BlockSpec((cout_f, 1), lambda b, i: (0, 0), **resident),
        ]
        out_specs = pl.BlockSpec((None, cout_f, tile_p), lambda b, i: (b, 0, i))
        return pl.pallas_call(
            _mlp_kernel,
            out_shape=jax.ShapeDtypeStruct((nb, cout_f, hw), x_nchw.dtype),
            grid_spec=pltpu.PrefetchScalarGridSpec(
                num_scalar_prefetch=0,
                grid=grid,
                in_specs=in_specs,
                out_specs=out_specs),
            compiler_params=pltpu.CompilerParams(
                dimension_semantics=("parallel", "parallel"),
                vmem_limit_bytes=vmem_limit),
        )

    try:
        # Preferred: resident weights single-buffered (constant index_map).
        out = build_call(True)(x_rows, w1t, b1c, w2t, b2c)
    except Exception:
        # Fallback: default double-buffering if this Pallas build rejects
        # pipeline_mode=pl.Buffered(1).
        out = build_call(False)(x_rows, w1t, b1c, w2t, b2c)

    # (N/bt, bt*Cout, H*W) -> (N, Cout, H, W): free reshape, already NCHW.
    return out.reshape(n, cout, h, w)


def _reference(x_nchw, w1, b1, w2, b2):
    x = jnp.transpose(x_nchw, (0, 2, 3, 1)).astype(jnp.float32)
    h = jnp.clip(x @ w1 + b1, 0.0, 6.0)
    o = h @ w2 + b2
    return jnp.transpose(o, (0, 3, 1, 2)).astype(x_nchw.dtype)


if __name__ == "__main__":
    key = jax.random.PRNGKey(0)
    k_x, k_w1, k_b1, k_w2, k_b2 = jax.random.split(key, 5)

    # Mlp(in_features=4, hidden_features=32, out_features=4)
    N, Cin, H, W = 2, 4, 16, 16
    Ch, Cout = 32, 4

    x = jax.random.normal(k_x, (N, Cin, H, W), dtype=jnp.float32)

    w1 = jax.random.normal(k_w1, (Cin, Ch), dtype=jnp.float32) * 0.1
    b1 = jax.random.normal(k_b1, (Ch,), dtype=jnp.float32) * 0.1
    w2 = jax.random.normal(k_w2, (Ch, Cout), dtype=jnp.float32) * 0.1
    b2 = jax.random.normal(k_b2, (Cout,), dtype=jnp.float32) * 0.1

    out = mlp_pallas(x, w1, b1, w2, b2)
    out = jax.block_until_ready(out)

    ref = _reference(x, w1, b1, w2, b2)
    assert out.shape == (N, Cout, H, W), out.shape
    assert jnp.allclose(out, ref, atol=1e-5, rtol=1e-5), "mismatch vs reference"

    print("KERNEL_OK")
</pallas_src>

<mosaic_0001>
module attributes {stable_mosaic.version = 11 : i64} {
  func.func @_mlp_kernel(%arg0: i32, %arg1: i32, %arg2: memref<1x8x128xf32, #tpu.memory_space<vmem>>, %arg3: memref<64x8xf32, #tpu.memory_space<vmem>>, %arg4: memref<64x1xf32, #tpu.memory_space<vmem>>, %arg5: memref<8x64xf32, #tpu.memory_space<vmem>>, %arg6: memref<8x1xf32, #tpu.memory_space<vmem>>, %arg7: memref<1x8x128xf32, #tpu.memory_space<vmem>>) attributes {dimension_semantics = [#tpu.dimension_semantics<parallel>, #tpu.dimension_semantics<parallel>], iteration_bounds = array<i64: 1, 2>, scalar_prefetch = 0 : i64, scratch_operands = 0 : i64, tpu.core_type = #tpu.core_type<tc>, window_params = [{transform_indices = @transform_0, window_bounds = array<i64: 1, 8, 128>}, {pipeline_mode = #tpu.pipeline_mode<synchronous>, transform_indices = @transform_1, window_bounds = array<i64: 64, 8>}, {pipeline_mode = #tpu.pipeline_mode<synchronous>, transform_indices = @transform_2, window_bounds = array<i64: 64, 1>}, {pipeline_mode = #tpu.pipeline_mode<synchronous>, transform_indices = @transform_3, window_bounds = array<i64: 8, 64>}, {pipeline_mode = #tpu.pipeline_mode<synchronous>, transform_indices = @transform_4, window_bounds = array<i64: 8, 1>}, {transform_indices = @transform_5, window_bounds = array<i64: 1, 8, 128>}]} {
    %c0 = arith.constant 0 : index
    %c0_0 = arith.constant 0 : index
    %c0_1 = arith.constant 0 : index
    %0 = vector.load %arg2[%c0, %c0_0, %c0_1] : memref<1x8x128xf32, #tpu.memory_space<vmem>>, vector<1x8x128xf32>
    %1 = vector.shape_cast %0 : vector<1x8x128xf32> to vector<8x128xf32>
    %c0_2 = arith.constant 0 : index
    %c0_3 = arith.constant 0 : index
    %2 = vector.load %arg3[%c0_2, %c0_3] : memref<64x8xf32, #tpu.memory_space<vmem>>, vector<64x8xf32>
    %cst = arith.constant dense<0.000000e+00> : vector<64x128xf32>
    %3 = tpu.matmul %2, %1, %cst {dimension_numbers = #tpu.dot_dimension_numbers<[1], [0], [0], [1], [0, 0, 1, 1], [], []>} : vector<64x8xf32>, vector<8x128xf32>, vector<64x128xf32> -> vector<64x128xf32>
    %c0_4 = arith.constant 0 : index
    %c0_5 = arith.constant 0 : index
    %4 = vector.load %arg4[%c0_4, %c0_5] : memref<64x1xf32, #tpu.memory_space<vmem>>, vector<64x1xf32>
    %5 = vector.broadcast %4 : vector<64x1xf32> to vector<64x128xf32>
    %6 = arith.addf %3, %5 : vector<64x128xf32>
    %cst_6 = arith.constant 0.000000e+00 : f32
    %cst_7 = arith.constant 6.000000e+00 : f32
    %7 = vector.broadcast %cst_6 : f32 to vector<64x128xf32>
    %8 = arith.maximumf %7, %6 : vector<64x128xf32>
    %9 = vector.broadcast %cst_7 : f32 to vector<64x128xf32>
    %10 = arith.minimumf %9, %8 : vector<64x128xf32>
    %c0_8 = arith.constant 0 : index
    %c0_9 = arith.constant 0 : index
    %11 = vector.load %arg5[%c0_8, %c0_9] : memref<8x64xf32, #tpu.memory_space<vmem>>, vector<8x64xf32>
    %cst_10 = arith.constant dense<0.000000e+00> : vector<8x128xf32>
    %12 = tpu.matmul %11, %10, %cst_10 {dimension_numbers = #tpu.dot_dimension_numbers<[1], [0], [0], [1], [0, 0, 1, 1], [], []>} : vector<8x64xf32>, vector<64x128xf32>, vector<8x128xf32> -> vector<8x128xf32>
    %c0_11 = arith.constant 0 : index
    %c0_12 = arith.constant 0 : index
    %13 = vector.load %arg6[%c0_11, %c0_12] : memref<8x1xf32, #tpu.memory_space<vmem>>, vector<8x1xf32>
    %14 = vector.broadcast %13 : vector<8x1xf32> to vector<8x128xf32>
    %15 = arith.addf %12, %14 : vector<8x128xf32>
    %c0_13 = arith.constant 0 : index
    %c0_14 = arith.constant 0 : index
    %c0_15 = arith.constant 0 : index
    %16 = vector.load %arg7[%c0_13, %c0_14, %c0_15] : memref<1x8x128xf32, #tpu.memory_space<vmem>>, vector<1x8x128xf32>
    %17 = vector.shape_cast %16 : vector<1x8x128xf32> to vector<8x128xf32>
    %18 = vector.shape_cast %15 : vector<8x128xf32> to vector<1x8x128xf32>
    tpu.vector_store %arg7[%c0_13, %c0_14, %c0_15], %18 {strides = array<i32>} : memref<1x8x128xf32, #tpu.memory_space<vmem>>, vector<1x8x128xf32>,
    return
  }
  func.func @transform_0(%arg0: i32, %arg1: i32) -> (i32, i32, i32) {
    %c0_i32 = arith.constant 0 : i32
    %c0_i32_0 = arith.constant 0 : i32
    return %arg0, %c0_i32, %arg1 : i32, i32, i32
  }
  func.func @transform_1(%arg0: i32, %arg1: i32) -> (i32, i32) {
    %c0_i32 = arith.constant 0 : i32
    %c0_i32_0 = arith.constant 0 : i32
    %c0_i32_1 = arith.constant 0 : i32
    return %c0_i32, %c0_i32_0 : i32, i32
  }
  func.func @transform_2(%arg0: i32, %arg1: i32) -> (i32, i32) {
    %c0_i32 = arith.constant 0 : i32
    %c0_i32_0 = arith.constant 0 : i32
    %c0_i32_1 = arith.constant 0 : i32
    return %c0_i32, %c0_i32_0 : i32, i32
  }
  func.func @transform_3(%arg0: i32, %arg1: i32) -> (i32, i32) {
    %c0_i32 = arith.constant 0 : i32
    %c0_i32_0 = arith.constant 0 : i32
    %c0_i32_1 = arith.constant 0 : i32
    return %c0_i32, %c0_i32_0 : i32, i32
  }
  func.func @transform_4(%arg0: i32, %arg1: i32) -> (i32, i32) {
    %c0_i32 = arith.constant 0 : i32
    %c0_i32_0 = arith.constant 0 : i32
    %c0_i32_1 = arith.constant 0 : i32
    return %c0_i32, %c0_i32_0 : i32, i32
  }
  func.func @transform_5(%arg0: i32, %arg1: i32) -> (i32, i32, i32) {
    %c0_i32 = arith.constant 0 : i32
    %c0_i32_0 = arith.constant 0 : i32
    return %arg0, %c0_i32, %arg1 : i32, i32, i32
  }
}

module attributes {stable_mosaic.version = 11 : i64} {
  func.func @_mlp_kernel(%arg0: i32, %arg1: i32, %arg2: memref<1x8x128xf32, #tpu.memory_space<vmem>>, %arg3: memref<64x8xf32, #tpu.memory_space<vmem>>, %arg4: memref<64x1xf32, #tpu.memory_space<vmem>>, %arg5: memref<8x64xf32, #tpu.memory_space<vmem>>, %arg6: memref<8x1xf32, #tpu.memory_space<vmem>>, %arg7: memref<1x8x128xf32, #tpu.memory_space<vmem>>) attributes {dimension_semantics = [#tpu.dimension_semantics<parallel>, #tpu.dimension_semantics<parallel>], iteration_bounds = array<i64: 1, 2>, scalar_prefetch = 0 : i64, scratch_operands = 0 : i64, tpu.core_type = #tpu.core_type<tc>, window_params = [{transform_indices = @transform_0, window_bounds = array<i64: 1, 8, 128>}, {pipeline_mode = #tpu.pipeline_mode<synchronous>, transform_indices = @transform_1, window_bounds = array<i64: 64, 8>}, {pipeline_mode = #tpu.pipeline_mode<synchronous>, transform_indices = @transform_2, window_bounds = array<i64: 64, 1>}, {pipeline_mode = #tpu.pipeline_mode<synchronous>, transform_indices = @transform_3, window_bounds = array<i64: 8, 64>}, {pipeline_mode = #tpu.pipeline_mode<synchronous>, transform_indices = @transform_4, window_bounds = array<i64: 8, 1>}, {transform_indices = @transform_5, window_bounds = array<i64: 1, 8, 128>}]} {
    %c0 = arith.constant 0 : index
    %c0_0 = arith.constant 0 : index
    %c0_1 = arith.constant 0 : index
    %0 = vector.load %arg2[%c0, %c0_0, %c0_1] : memref<1x8x128xf32, #tpu.memory_space<vmem>>, vector<1x8x128xf32>
    %1 = vector.shape_cast %0 : vector<1x8x128xf32> to vector<8x128xf32>
    %c0_2 = arith.constant 0 : index
    %c0_3 = arith.constant 0 : index
    %2 = vector.load %arg3[%c0_2, %c0_3] : memref<64x8xf32, #tpu.memory_space<vmem>>, vector<64x8xf32>
    %cst = arith.constant dense<0.000000e+00> : vector<64x128xf32>
    %3 = tpu.matmul %2, %1, %cst {dimension_numbers = #tpu.dot_dimension_numbers<[1], [0], [0], [1], [0, 0, 1, 1], [], []>} : vector<64x8xf32>, vector<8x128xf32>, vector<64x128xf32> -> vector<64x128xf32>
    %c0_4 = arith.constant 0 : index
    %c0_5 = arith.constant 0 : index
    %4 = vector.load %arg4[%c0_4, %c0_5] : memref<64x1xf32, #tpu.memory_space<vmem>>, vector<64x1xf32>
    %5 = vector.broadcast %4 : vector<64x1xf32> to vector<64x128xf32>
    %6 = arith.addf %3, %5 : vector<64x128xf32>
    %cst_6 = arith.constant 0.000000e+00 : f32
    %cst_7 = arith.constant 6.000000e+00 : f32
    %7 = vector.broadcast %cst_6 : f32 to vector<64x128xf32>
    %8 = arith.maximumf %7, %6 : vector<64x128xf32>
    %9 = vector.broadcast %cst_7 : f32 to vector<64x128xf32>
    %10 = arith.minimumf %9, %8 : vector<64x128xf32>
    %c0_8 = arith.constant 0 : index
    %c0_9 = arith.constant 0 : index
    %11 = vector.load %arg5[%c0_8, %c0_9] : memref<8x64xf32, #tpu.memory_space<vmem>>, vector<8x64xf32>
    %cst_10 = arith.constant dense<0.000000e+00> : vector<8x128xf32>
    %12 = tpu.matmul %11, %10, %cst_10 {dimension_numbers = #tpu.dot_dimension_numbers<[1], [0], [0], [1], [0, 0, 1, 1], [], []>} : vector<8x64xf32>, vector<64x128xf32>, vector<8x128xf32> -> vector<8x128xf32>
    %c0_11 = arith.constant 0 : index
    %c0_12 = arith.constant 0 : index
    %13 = vector.load %arg6[%c0_11, %c0_12] : memref<8x1xf32, #tpu.memory_space<vmem>>, vector<8x1xf32>
    %14 = vector.broadcast %13 : vector<8x1xf32> to vector<8x128xf32>
    %15 = arith.addf %12, %14 : vector<8x128xf32>
    %c0_13 = arith.constant 0 : index
    %c0_14 = arith.constant 0 : index
    %c0_15 = arith.constant 0 : index
    %16 = vector.load %arg7[%c0_13, %c0_14, %c0_15] : memref<1x8x128xf32, #tpu.memory_space<vmem>>, vector<1x8x128xf32>
    %17 = vector.shape_cast %16 : vector<1x8x128xf32> to vector<8x128xf32>
    %18 = vector.shape_cast %15 : vector<8x128xf32> to vector<1x8x128xf32>
    tpu.vector_store %arg7[%c0_13, %c0_14, %c0_15], %18 {strides = array<i32>} : memref<1x8x128xf32, #tpu.memory_space<vmem>>, vector<1x8x128xf32>,
    return
  }
  func.func @transform_0(%arg0: i32, %arg1: i32) -> (i32, i32, i32) {
    %c0_i32 = arith.constant 0 : i32
    %c0_i32_0 = arith.constant 0 : i32
    return %arg0, %c0_i32, %arg1 : i32, i32, i32
  }
  func.func @transform_1(%arg0: i32, %arg1: i32) -> (i32, i32) {
    %c0_i32 = arith.constant 0 : i32
    %c0_i32_0 = arith.constant 0 : i32
    %c0_i32_1 = arith.constant 0 : i32
    return %c0_i32, %c0_i32_0 : i32, i32
  }
  func.func @transform_2(%arg0: i32, %arg1: i32) -> (i32, i32) {
    %c0_i32 = arith.constant 0 : i32
    %c0_i32_0 = arith.constant 0 : i32
    %c0_i32_1 = arith.constant 0 : i32
    return %c0_i32, %c0_i32_0 : i32, i32
  }
  func.func @transform_3(%arg0: i32, %arg1: i32) -> (i32, i32) {
    %c0_i32 = arith.constant 0 : i32
    %c0_i32_0 = arith.constant 0 : i32
    %c0_i32_1 = arith.constant 0 : i32
    return %c0_i32, %c0_i32_0 : i32, i32
  }
  func.func @transform_4(%arg0: i32, %arg1: i32) -> (i32, i32) {
    %c0_i32 = arith.constant 0 : i32
    %c0_i32_0 = arith.constant 0 : i32
    %c0_i32_1 = arith.constant 0 : i32
    return %c0_i32, %c0_i32_0 : i32, i32
  }
  func.func @transform_5(%arg0: i32, %arg1: i32) -> (i32, i32, i32) {
    %c0_i32 = arith.constant 0 : i32
    %c0_i32_0 = arith.constant 0 : i32
    return %arg0, %c0_i32, %arg1 : i32, i32, i32
  }
}

</mosaic_0001>

<bundles_post_ra>
// kernel: tpu_custom_call.1
= control target key start
LH: loop header
LB: loop body
LE: loop exit
PB: predicated region body
PF: predicated region fallthrough
CT: control target
= control target key end

     0   :  { %10 = vsyncpa [#allocation3], 0  ;;  %s1057_s0 = inlined_call_operand.vmem [shape: f32[1,8,256], index: 0, kind: input, shape index: {}]   ;;  %s1058_s1 = inlined_call_operand.vmem [shape: f32[64,8], index: 1, kind: input, shape index: {}]   ;;  %s1059_s2 = inlined_call_operand.vmem [shape: f32[64,1], index: 2, kind: input, shape index: {}]   ;;  %s1060_s3 = inlined_call_operand.vmem [shape: f32[8,64], index: 3, kind: input, shape index: {}]   ;;  %s1061_s4 = inlined_call_operand.vmem [shape: f32[8,1], index: 4, kind: input, shape index: {}]   ;;  %s1062_s5 = inlined_call_operand.hbm [shape: f32[1,8,256], index: 5, kind: output, shape index: {}]  }
   0x1   :  { %12 = vsyncpa [#allocation3 + $0x1], 0  ;;  %s883_s18 = smov 0   ;;  %s885_s19 = smov 0  }
   0x2   :  { %s887_s20 = smov 0   ;;  %s889_s21 = smov 0  }
   0x3   :  { %s891_s22 = smov 0   ;;  %s893_s23 = smov 0  }
   0x4 LB: > { %s624_s24 = sadd.s32 4294967295, %s846_s23   ;;  %s625_s25 = sadd.s32 4294967294, %s846_s23   ;;  %s846_s23 = sphi %s893_s23, %s18_s23   ;;  %s842_s22 = sphi %s891_s22, %s1069_s22   ;;  %s838_s21 = sphi %s889_s21, %s1068_s21   ;;  %s834_s20 = sphi %s887_s20, %s1067_s20   ;;  %s830_s19 = sphi %s885_s19, %s1066_s19   ;;  %s826_s18 = sphi %s883_s18, %s1065_s18  }
   0x5   : > { %s27_s26 = sadd.s32 1, %s842_s22  ;;  %s151_s27 = sadd.s32 1, %s834_s20 }
   0x6   : > { %p28_p0 = scmp.ge.s32.totalorder %s27_s26, 2  ;;  %p161_p1 = scmp.ne.s32.totalorder %s834_s20, %s830_s19 }
   0x7   : > { %p162_p2 = scmp.eq.s32.totalorder %s624_s24, 1  ;;  %p167_p3 = scmp.ne.s32.totalorder %s830_s19, %s826_s18 }
   0x8   : > { %s1071_s26 = smov (%p28_p0, %s27_s26), 0  ;;  %p168_p5 = scmp.eq.s32.totalorder %s625_s25, 1 }
   0x9   : > { %p923_p4 = por %p162_p2, %p161_p1  ;;  %s147_s29 = ssub.s32 %s842_s22, %s1071_s26 }
   0xa   : > { %p628_p6 = scmp.ge.s32.totalorder %s846_s23, 1  ;;  %p149_p7 = scmp.eq.s32.totalorder %s147_s29, 0 }
   0xb   : > { %p930_p8 = por %p168_p5, %p167_p3  ;;  %p209_p9 = scmp.lt.s32.totalorder %s846_s23, 3 }
   0xc   : > { %s936_s6 = scalar_select %p149_p7, %s834_s20, %s151_s27  }
   0xd   : > { %p210_p10 = pnand %p628_p6, %p209_p9 }
   0xe   : > { %p242_p11 = scmp.lt.s32.totalorder (!%p210_p10), %s838_s21, 1  ;;  %v249_v0 = vld [vmem:[%s1058_s1] sm:$0xff] (!%p210_p10)  ;;  %vm305_vm0 = vcmask (!%p210_p10), 64512   ;;  %v848_v1 = vmov (!%p210_p10), 0   ;;  %v259_v3 = vld [vmem:[%s1059_s2 + $0x10] sm:$0xff] (!%p210_p10)  ;;  %v258_v4 = vld [vmem:[%s1059_s2 + $0x8] sm:$0xff] (!%p210_p10) }
   0xf   : > { %213 = sbr.rel (%p210_p10) target bundleno = 493 (0x1ed), region = 40  ;;  %664 = vmatprep.mubr.msk.f32.mxu0 (!%p210_p10), %vm305_vm0, %v249_v0  ;;  %766 = vset.pattern.permute.xlu0 (!%p210_p10), %v848_v1  ;;  %v257_v2 = vld [vmem:[%s1059_s2] sm:$0xff] (!%p210_p10)  ;;  %v260_v5 = vld [vmem:[%s1059_s2 + $0x18] sm:$0xff] (!%p210_p10)  ;;  %v250_v7 = vld [vmem:[%s1058_s1 + $0x8] sm:$0xff] (!%p210_p10)  ;;  %v849_v19 = vmov (!%p210_p10), 0.0|0.0   ;;  %vm850_vm1 = vmmov (!%p210_p10), 0  }
  0x10   : > { %767 = vset.pattern.permute.xlu1 (!%p210_p10), %v848_v1  ;;  %267 = vperm.xlu0 (!%p210_p10), %766, %v257_v2   ;;  %v251_v8 = vld [vmem:[%s1058_s1 + $0x10] sm:$0xff] (!%p210_p10)  ;;  %v261_v9 = vld [vmem:[%s1059_s2 + $0x20] sm:$0xff] (!%p210_p10)  ;;  %v262_v10 = vld [vmem:[%s1059_s2 + $0x28] sm:$0xff] (!%p210_p10)  ;;  %v851_v20 = vmov (!%p210_p10), 0.0   ;;  %vm458_vm2 = vcmask (!%p210_p10), 523264   ;;  %s237_s24 = sand.u32 (!%p210_p10), 1, %s830_s19  }
  0x11   : > { %277 = vperm.xlu1 (!%p210_p10), %767, %v259_v3   ;;  %v252_v11 = vld [vmem:[%s1058_s1 + $0x18] sm:$0xff] (!%p210_p10)  ;;  %v253_v12 = vld [vmem:[%s1058_s1 + $0x20] sm:$0xff] (!%p210_p10)  ;;  %v263_v13 = vld [vmem:[%s1059_s2 + $0x30] sm:$0xff] (!%p210_p10)  ;;  %695 = vmatprep.subr.bf16.mxu1 (!%p210_p10), %v849_v19  ;;  %s641_s27 = sshll.u32 (!%p210_p10), %s838_s21, 7  ;;  %s534_s11 = scalar_lea.sflag (!%p210_p10), [#allocation3], %s237_s24 }
  0x12   : > { %v264_v14 = vld [vmem:[%s1059_s2 + $0x38] sm:$0xff] (!%p210_p10)  ;;  %v254_v15 = vld [vmem:[%s1058_s1 + $0x28] sm:$0xff] (!%p210_p10)  ;;  %v255_v16 = vld [vmem:[%s1058_s1 + $0x30] sm:$0xff] (!%p210_p10)  ;;  %692 = vmatprep.mubr.msk.f32.mxu1 (!%p210_p10), %vm850_vm1, %v851_v20  ;;  %s1010_s10 = scalar_lea.hbm (!%p210_p10), %s1062_s5, %s641_s27 }
  0x13   : > { %v452_v17 = vld [vmem:[%s1061_s4] sm:$0xff] (!%p210_p10)  ;;  %v256_v18 = vld [vmem:[%s1058_s1 + $0x38] sm:$0xff] (!%p210_p10) }
  0x14   : > { %272 = vperm.xlu0 (!%p210_p10), %766, %v258_v4   ;;  %v451_v1 = vld [vmem:[%s1060_s3] sm:$0xff] (!%p210_p10) }
  0x15   : > { %282 = vperm.xlu1 (!%p210_p10), %767, %v260_v5  }
  0x16   : > { %s243_s9 = scalar_select %p242_p11, %s838_s21, 1 }
  0x17   : > { %s852_s21 = smov [#allocation2]  }
  0x18   : > { %s630_s14 = sshll.u32 %s243_s9, 3  ;;  %287 = vperm.xlu0 %766, %v261_v9   ;;  %s772_s13 = sshll.u32 %s852_s21, 4  ;;  %s773_s13 = int_to_ptr.vmem [resolvable:$false] %s772_s13 }
  0x19   : > { %s247_s25 = scalar_lea.vmem %s1057_s0, %s630_s14  ;;  %292 = vperm.xlu1 %767, %v262_v10   ;;  %s774_s14 = scalar_lea.vmem %s773_s13, 256 }
  0x1a   : > { %v248_v6 = vld [vmem:[%s247_s25] sm:$0xff]  ;;  %s629_s25 = sshll.u32 %s237_s24, 3 }
  0x1b   : > { %662 = vmatprep.subr.mxu0 %v248_v6  ;;  %s239_s29 = scalar_lea.vmem [#allocation2], %s629_s25 }
  0x1c   : > { %663 = vmatpush3.msra.mxu0 %v248_v6  ;;  %297 = vperm.xlu0 %766, %v263_v13   ;;  %s549_s7 = sshll.u32 %s239_s29, 4  ;;  %s1012_s7 = int_to_ptr.vmem [resolvable:$true] %s549_s7 }
  0x1d   : > { %665 = vmatmul.mubr.msk.f32.vlgmr.msra.gmra.mrb[0].mxu0 %vm305_vm0, %v250_v7  ;;  %302 = vperm.xlu1 %767, %v264_v14   ;;  %s768_s12 = scalar_lea.vmem %s1012_s7, 128  ;;  %p775_p1 = scmp.lt.s32.totalorder %s1012_s7, %s773_s13 }
  0x1e   : > { %667 = vmatprep.mubr.msk.f32.mxu0 %vm305_vm0, %v251_v8  ;;  %p769_p12 = scmp.ne.s32.totalorder %s1012_s7, %s768_s12  ;;  %p776_p2 = scmp.lt.s32.totalorder %s774_s14, %s768_s12 }
  0x20   : > { %455 = vperm.xlu0 %766, %v452_v17   ;;  %p770_p13 = pnand %p769_p12, %p923_p4  ;;  %p777_p3 = por %p776_p2, %p775_p1 }
  0x21   : > { %668 = vmatmul.mubr.msk.f32.gmra.mrb[2].mxu0 %vm305_vm0, %v252_v11 }
  0x22   : > { %670 = vmatprep.mubr.msk.f32.mxu0 %vm305_vm0, %v253_v12  ;;  %p771_p0 = pneg %p770_p13 }
  0x24   : > { %p778_p5 = pnand %p777_p3, %p771_p0 }
  0x25   : > { %671 = vmatmul.mubr.msk.f32.gmra.mrb[4].mxu0 %vm305_vm0, %v254_v15 }
  0x26   : > { %673 = vmatprep.mubr.msk.f32.mxu0 %vm305_vm0, %v255_v16 }
  0x29   : > { %674 = vmatmul.mubr.msk.f32.gmra.mrb[6].mxu0 %vm305_vm0, %v256_v18 }
  0x8f   : > { %v268_v21 = vpop.permute.xlu0 %267 }
  0x90   : > { %v278_v22 = vpop.permute.xlu1 %277 }
  0x93   : > { %v273_v23 = vpop.permute.xlu0 %272 }
  0x94   : > { %v283_v24 = vpop.permute.xlu1 %282 }
  0x97   : > { %v288_v38 = vpop.permute.xlu0 %287 }
  0x98   : > { %v293_v35 = vpop.permute.xlu1 %292 }
  0x9b   : > { %v298_v53 = vpop.permute.xlu0 %297 }
  0x9c   : > { %v303_v49 = vpop.permute.xlu1 %302 }
  0x9f   : > { %v456_v2 = vpop.permute.xlu0 %455 }
  0xf0   : > { %v666_v25 = vpop.f32.mrb[0].mxu0 }
  0xf1   : > { %v402_v26 = vadd.f32 %v666_v25, %v273_v23  ;;  %v396_v27 = vpop.f32.mrb[1].mxu0 }
  0xf2   : > { %v397_v28 = vadd.f32 %v396_v27, %v268_v21 }
  0xf3   : > { %v436_v29 = vmax.f32 %v402_v26, 0.0 }
  0xf4   : > { %v435_v30 = vmax.f32 %v397_v28, 0.0  ;;  %v669_v31 = vpop.f32.mrb[2].mxu0 }
  0xf5   : > { %v444_v32 = vmin.f32 %v436_v29, 6.0  ;;  %v412_v33 = vadd.f32 %v669_v31, %v283_v24  ;;  %v406_v34 = vpop.f32.mrb[3].mxu0 }
  0xf6   : > { %v443_v36 = vmin.f32 %v435_v30, 6.0  ;;  %v407_v37 = vadd.f32 %v406_v34, %v278_v22 }
  0xf7   : > { %v438_v39 = vmax.f32 %v412_v33, 0.0 }
  0xf8   : > { %v437_v40 = vmax.f32 %v407_v37, 0.0  ;;  %v672_v41 = vpop.f32.mrb[4].mxu0  ;;  %v696_v42 = vpack.c.bf16 %v444_v32, %v443_v36 }
  0xf9   : > { %v446_v43 = vmin.f32 %v438_v39, 6.0  ;;  %v422_v44 = vadd.f32 %v672_v41, %v293_v35  ;;  %v416_v45 = vpop.f32.mrb[5].mxu0 }
  0xfa   : > { %v445_v46 = vmin.f32 %v437_v40, 6.0  ;;  %v417_v47 = vadd.f32 %v416_v45, %v288_v38  ;;  %697 = vmatpush3.bf16.msra.mxu1 %v696_v42 }
  0xfb   : > { %v440_v48 = vmax.f32 %v422_v44, 0.0  ;;  %698 = vmatprep.subr.bf16.mxu1 %v849_v19 }
  0xfc   : > { %v699_v50 = vpack.c.bf16 %v446_v43, %v445_v46  ;;  %v439_v51 = vmax.f32 %v417_v47, 0.0  ;;  %v675_v52 = vpop.f32.mrb[6].mxu0 }
  0xfd   : > { %v448_v54 = vmin.f32 %v440_v48, 6.0  ;;  %v432_v55 = vadd.f32 %v675_v52, %v303_v49  ;;  %v426_v56 = vpop.f32.mrb[7].mxu0 }
  0xfe   : > { %v447_v57 = vmin.f32 %v439_v51, 6.0  ;;  %v427_v58 = vadd.f32 %v426_v56, %v298_v53  ;;  %700 = vmatpush3.bf16.msra.mxu1 %v699_v50 }
  0xff   : > { %v442_v59 = vmax.f32 %v432_v55, 0.0  ;;  %701 = vmatprep.subr.bf16.mxu1 %v849_v19 }
 0x100   : > { %v702_v60 = vpack.c.bf16 %v448_v54, %v447_v57  ;;  %v441_v61 = vmax.f32 %v427_v58, 0.0 }
 0x101   : > { %v450_v62 = vmin.f32 %v442_v59, 6.0 }
 0x102   : > { %v449_v63 = vmin.f32 %v441_v61, 6.0  ;;  %703 = vmatpush3.bf16.msra.mxu1 %v702_v60 }
 0x103   : > { %704 = vmatprep.subr.bf16.mxu1 %v849_v19 }
 0x104   : > { %v705_v0 = vpack.c.bf16 %v450_v62, %v449_v63 }
 0x106   : > { %706 = vmatpush3.bf16.msra.mxu1 %v705_v0 }
 0x109   : > { %693 = vmatmul.mubr.msk.f32.vlgmr.msra.gmra.mrb[0].mxu1 %vm458_vm2, %v451_v1 }
 0x1dc   : > { %v528_v3 = vpop.f32.mrb[0].mxu1 }
 0x1dd   : > { %v529_v4 = vadd.f32 %v528_v3, %v456_v2  ;;  %v694_v5 = vpop.f32.mrb[1].mxu1 }
 0x1df   : > { %532 = vst [vmem:[%s239_s29] sm:$0xff] %v529_v4 }
 0x1e0   : > { %781 = shalt.err (!%p778_p5)
}
 0x1e1   : > { %s782_s15 = scalar_lea.hbm %s1010_s10, 128  ;;  %s786_s24 = scalar_lea.hbm %s1062_s5, 256 }
 0x1e2   : > { %p783_p6 = scmp.ne.s32.totalorder %s1010_s10, %s782_s15  ;;  %p787_p10 = scmp.lt.u32.totalorder %s1010_s10, %s1062_s5 }
 0x1e3   : > { %p788_p11 = scmp.lt.u32.totalorder %s786_s24, %s782_s15  ;;  %p790_p13 = scmp.lt.u32.totalorder %s782_s15, %s1010_s10 }
 0x1e4   : > { %p784_p7 = pnand %p783_p6, %p923_p4 }
 0x1e5   : > { %p789_p12 = por %p788_p11, %p787_p10 }
 0x1e6   : > { %p785_p9 = pneg %p784_p7 }
 0x1e7   : > { %p791_p0 = por %p790_p13, %p789_p12 }
 0x1e9   : > { %p792_p1 = pnand %p791_p0, %p785_p9 }
 0x1eb   : > { %795 = shalt.err (!%p792_p1)
}
 0x1ec   : > { %707 = dma.vmem_to_hbm [thread:$0]  (%p923_p4), %s1012_s7, 128, %s1010_s10, %s534_s11  }
 0x1ed PF: > { %p713_p2 = scmp.ge.s32.totalorder %s846_s23, 2  ;;  %s561_s29 = sand.u32 1, %s826_s18  }
 0x1ee   : > { %s562_s8 = scalar_lea.sflag [#allocation3], %s561_s29 }
 0x1ef   : > { %p710_p3 = pnand %p713_p2, %p930_p8 }
 0x1f1   : > { %821 = dma.done.wait (!%p710_p3), %s562_s8, 128  }
 0x1f2   : > { %823 = vsyncadd (!%p710_p3), %s562_s8, 4294967168  ;;  %s18_s23 = sadd.s32 1, %s846_s23   ;;  %s1065_s18 = smov %s830_s19 }
 0x1f3   : > { %p15_p5 = scmp.ge.s32.totalorder %s18_s23, 4   ;;  %s1066_s19 = smov %s834_s20 }
 0x1f4   : > { %s1067_s20 = smov %s936_s6  ;;  %s1068_s21 = smov %s842_s22 }
 0x1f5   : > { %s1069_s22 = smov %s1071_s26  ;;  %17 = sbr.rel (!%p15_p5) target bundleno = 4 (0x4), region = 75 }
 0x1fc   :  { %567 = vsyncpa [#allocation3], 1 }
 0x1fd   :  { %569 = vsyncpa [#allocation3 + $0x1], 1 }

// kernel: tpu_custom_call.1
= control target key start
LH: loop header
LB: loop body
LE: loop exit
PB: predicated region body
PF: predicated region fallthrough
CT: control target
= control target key end

     0   :  { %10 = vsyncpa [#allocation3], 0  ;;  %s1057_s0 = inlined_call_operand.vmem [shape: f32[1,8,256], index: 0, kind: input, shape index: {}]   ;;  %s1058_s1 = inlined_call_operand.vmem [shape: f32[64,8], index: 1, kind: input, shape index: {}]   ;;  %s1059_s2 = inlined_call_operand.vmem [shape: f32[64,1], index: 2, kind: input, shape index: {}]   ;;  %s1060_s3 = inlined_call_operand.vmem [shape: f32[8,64], index: 3, kind: input, shape index: {}]   ;;  %s1061_s4 = inlined_call_operand.vmem [shape: f32[8,1], index: 4, kind: input, shape index: {}]   ;;  %s1062_s5 = inlined_call_operand.hbm [shape: f32[1,8,256], index: 5, kind: output, shape index: {}]  }
   0x1   :  { %12 = vsyncpa [#allocation3 + $0x1], 0  ;;  %s883_s18 = smov 0   ;;  %s885_s19 = smov 0  }
   0x2   :  { %s887_s20 = smov 0   ;;  %s889_s21 = smov 0  }
   0x3   :  { %s891_s22 = smov 0   ;;  %s893_s23 = smov 0  }
   0x4 LB: > { %s624_s24 = sadd.s32 4294967295, %s846_s23   ;;  %s625_s25 = sadd.s32 4294967294, %s846_s23   ;;  %s846_s23 = sphi %s893_s23, %s18_s23   ;;  %s842_s22 = sphi %s891_s22, %s1069_s22   ;;  %s838_s21 = sphi %s889_s21, %s1068_s21   ;;  %s834_s20 = sphi %s887_s20, %s1067_s20   ;;  %s830_s19 = sphi %s885_s19, %s1066_s19   ;;  %s826_s18 = sphi %s883_s18, %s1065_s18  }
   0x5   : > { %s27_s26 = sadd.s32 1, %s842_s22  ;;  %s151_s27 = sadd.s32 1, %s834_s20 }
   0x6   : > { %p28_p0 = scmp.ge.s32.totalorder %s27_s26, 2  ;;  %p161_p1 = scmp.ne.s32.totalorder %s834_s20, %s830_s19 }
   0x7   : > { %p162_p2 = scmp.eq.s32.totalorder %s624_s24, 1  ;;  %p167_p3 = scmp.ne.s32.totalorder %s830_s19, %s826_s18 }
   0x8   : > { %s1071_s26 = smov (%p28_p0, %s27_s26), 0  ;;  %p168_p5 = scmp.eq.s32.totalorder %s625_s25, 1 }
   0x9   : > { %p923_p4 = por %p162_p2, %p161_p1  ;;  %s147_s29 = ssub.s32 %s842_s22, %s1071_s26 }
   0xa   : > { %p628_p6 = scmp.ge.s32.totalorder %s846_s23, 1  ;;  %p149_p7 = scmp.eq.s32.totalorder %s147_s29, 0 }
   0xb   : > { %p930_p8 = por %p168_p5, %p167_p3  ;;  %p209_p9 = scmp.lt.s32.totalorder %s846_s23, 3 }
   0xc   : > { %s936_s6 = scalar_select %p149_p7, %s834_s20, %s151_s27  }
   0xd   : > { %p210_p10 = pnand %p628_p6, %p209_p9 }
   0xe   : > { %p242_p11 = scmp.lt.s32.totalorder (!%p210_p10), %s838_s21, 1  ;;  %v249_v0 = vld [vmem:[%s1058_s1] sm:$0xff] (!%p210_p10)  ;;  %vm305_vm0 = vcmask (!%p210_p10), 64512   ;;  %v848_v1 = vmov (!%p210_p10), 0   ;;  %v259_v3 = vld [vmem:[%s1059_s2 + $0x10] sm:$0xff] (!%p210_p10)  ;;  %v258_v4 = vld [vmem:[%s1059_s2 + $0x8] sm:$0xff] (!%p210_p10) }
   0xf   : > { %213 = sbr.rel (%p210_p10) target bundleno = 493 (0x1ed), region = 40  ;;  %664 = vmatprep.mubr.msk.f32.mxu0 (!%p210_p10), %vm305_vm0, %v249_v0  ;;  %766 = vset.pattern.permute.xlu0 (!%p210_p10), %v848_v1  ;;  %v257_v2 = vld [vmem:[%s1059_s2] sm:$0xff] (!%p210_p10)  ;;  %v260_v5 = vld [vmem:[%s1059_s2 + $0x18] sm:$0xff] (!%p210_p10)  ;;  %v250_v7 = vld [vmem:[%s1058_s1 + $0x8] sm:$0xff] (!%p210_p10)  ;;  %v849_v19 = vmov (!%p210_p10), 0.0|0.0   ;;  %vm850_vm1 = vmmov (!%p210_p10), 0  }
  0x10   : > { %767 = vset.pattern.permute.xlu1 (!%p210_p10), %v848_v1  ;;  %267 = vperm.xlu0 (!%p210_p10), %766, %v257_v2   ;;  %v251_v8 = vld [vmem:[%s1058_s1 + $0x10] sm:$0xff] (!%p210_p10)  ;;  %v261_v9 = vld [vmem:[%s1059_s2 + $0x20] sm:$0xff] (!%p210_p10)  ;;  %v262_v10 = vld [vmem:[%s1059_s2 + $0x28] sm:$0xff] (!%p210_p10)  ;;  %v851_v20 = vmov (!%p210_p10), 0.0   ;;  %vm458_vm2 = vcmask (!%p210_p10), 523264   ;;  %s237_s24 = sand.u32 (!%p210_p10), 1, %s830_s19  }
  0x11   : > { %277 = vperm.xlu1 (!%p210_p10), %767, %v259_v3   ;;  %v252_v11 = vld [vmem:[%s1058_s1 + $0x18] sm:$0xff] (!%p210_p10)  ;;  %v253_v12 = vld [vmem:[%s1058_s1 + $0x20] sm:$0xff] (!%p210_p10)  ;;  %v263_v13 = vld [vmem:[%s1059_s2 + $0x30] sm:$0xff] (!%p210_p10)  ;;  %695 = vmatprep.subr.bf16.mxu1 (!%p210_p10), %v849_v19  ;;  %s641_s27 = sshll.u32 (!%p210_p10), %s838_s21, 7  ;;  %s534_s11 = scalar_lea.sflag (!%p210_p10), [#allocation3], %s237_s24 }
  0x12   : > { %v264_v14 = vld [vmem:[%s1059_s2 + $0x38] sm:$0xff] (!%p210_p10)  ;;  %v254_v15 = vld [vmem:[%s1058_s1 + $0x28] sm:$0xff] (!%p210_p10)  ;;  %v255_v16 = vld [vmem:[%s1058_s1 + $0x30] sm:$0xff] (!%p210_p10)  ;;  %692 = vmatprep.mubr.msk.f32.mxu1 (!%p210_p10), %vm850_vm1, %v851_v20  ;;  %s1010_s10 = scalar_lea.hbm (!%p210_p10), %s1062_s5, %s641_s27 }
  0x13   : > { %v452_v17 = vld [vmem:[%s1061_s4] sm:$0xff] (!%p210_p10)  ;;  %v256_v18 = vld [vmem:[%s1058_s1 + $0x38] sm:$0xff] (!%p210_p10) }
  0x14   : > { %272 = vperm.xlu0 (!%p210_p10), %766, %v258_v4   ;;  %v451_v1 = vld [vmem:[%s1060_s3] sm:$0xff] (!%p210_p10) }
  0x15   : > { %282 = vperm.xlu1 (!%p210_p10), %767, %v260_v5  }
  0x16   : > { %s243_s9 = scalar_select %p242_p11, %s838_s21, 1 }
  0x17   : > { %s852_s21 = smov [#allocation2]  }
  0x18   : > { %s630_s14 = sshll.u32 %s243_s9, 3  ;;  %287 = vperm.xlu0 %766, %v261_v9   ;;  %s772_s13 = sshll.u32 %s852_s21, 4  ;;  %s773_s13 = int_to_ptr.vmem [resolvable:$false] %s772_s13 }
  0x19   : > { %s247_s25 = scalar_lea.vmem %s1057_s0, %s630_s14  ;;  %292 = vperm.xlu1 %767, %v262_v10   ;;  %s774_s14 = scalar_lea.vmem %s773_s13, 256 }
  0x1a   : > { %v248_v6 = vld [vmem:[%s247_s25] sm:$0xff]  ;;  %s629_s25 = sshll.u32 %s237_s24, 3 }
  0x1b   : > { %662 = vmatprep.subr.mxu0 %v248_v6  ;;  %s239_s29 = scalar_lea.vmem [#allocation2], %s629_s25 }
  0x1c   : > { %663 = vmatpush3.msra.mxu0 %v248_v6  ;;  %297 = vperm.xlu0 %766, %v263_v13   ;;  %s549_s7 = sshll.u32 %s239_s29, 4  ;;  %s1012_s7 = int_to_ptr.vmem [resolvable:$true] %s549_s7 }
  0x1d   : > { %665 = vmatmul.mubr.msk.f32.vlgmr.msra.gmra.mrb[0].mxu0 %vm305_vm0, %v250_v7  ;;  %302 = vperm.xlu1 %767, %v264_v14   ;;  %s768_s12 = scalar_lea.vmem %s1012_s7, 128  ;;  %p775_p1 = scmp.lt.s32.totalorder %s1012_s7, %s773_s13 }
  0x1e   : > { %667 = vmatprep.mubr.msk.f32.mxu0 %vm305_vm0, %v251_v8  ;;  %p769_p12 = scmp.ne.s32.totalorder %s1012_s7, %s768_s12  ;;  %p776_p2 = scmp.lt.s32.totalorder %s774_s14, %s768_s12 }
  0x20   : > { %455 = vperm.xlu0 %766, %v452_v17   ;;  %p770_p13 = pnand %p769_p12, %p923_p4  ;;  %p777_p3 = por %p776_p2, %p775_p1 }
  0x21   : > { %668 = vmatmul.mubr.msk.f32.gmra.mrb[2].mxu0 %vm305_vm0, %v252_v11 }
  0x22   : > { %670 = vmatprep.mubr.msk.f32.mxu0 %vm305_vm0, %v253_v12  ;;  %p771_p0 = pneg %p770_p13 }
  0x24   : > { %p778_p5 = pnand %p777_p3, %p771_p0 }
  0x25   : > { %671 = vmatmul.mubr.msk.f32.gmra.mrb[4].mxu0 %vm305_vm0, %v254_v15 }
  0x26   : > { %673 = vmatprep.mubr.msk.f32.mxu0 %vm305_vm0, %v255_v16 }
  0x29   : > { %674 = vmatmul.mubr.msk.f32.gmra.mrb[6].mxu0 %vm305_vm0, %v256_v18 }
  0x8f   : > { %v268_v21 = vpop.permute.xlu0 %267 }
  0x90   : > { %v278_v22 = vpop.permute.xlu1 %277 }
  0x93   : > { %v273_v23 = vpop.permute.xlu0 %272 }
  0x94   : > { %v283_v24 = vpop.permute.xlu1 %282 }
  0x97   : > { %v288_v38 = vpop.permute.xlu0 %287 }
  0x98   : > { %v293_v35 = vpop.permute.xlu1 %292 }
  0x9b   : > { %v298_v53 = vpop.permute.xlu0 %297 }
  0x9c   : > { %v303_v49 = vpop.permute.xlu1 %302 }
  0x9f   : > { %v456_v2 = vpop.permute.xlu0 %455 }
  0xf0   : > { %v666_v25 = vpop.f32.mrb[0].mxu0 }
  0xf1   : > { %v402_v26 = vadd.f32 %v666_v25, %v273_v23  ;;  %v396_v27 = vpop.f32.mrb[1].mxu0 }
  0xf2   : > { %v397_v28 = vadd.f32 %v396_v27, %v268_v21 }
  0xf3   : > { %v436_v29 = vmax.f32 %v402_v26, 0.0 }
  0xf4   : > { %v435_v30 = vmax.f32 %v397_v28, 0.0  ;;  %v669_v31 = vpop.f32.mrb[2].mxu0 }
  0xf5   : > { %v444_v32 = vmin.f32 %v436_v29, 6.0  ;;  %v412_v33 = vadd.f32 %v669_v31, %v283_v24  ;;  %v406_v34 = vpop.f32.mrb[3].mxu0 }
  0xf6   : > { %v443_v36 = vmin.f32 %v435_v30, 6.0  ;;  %v407_v37 = vadd.f32 %v406_v34, %v278_v22 }
  0xf7   : > { %v438_v39 = vmax.f32 %v412_v33, 0.0 }
  0xf8   : > { %v437_v40 = vmax.f32 %v407_v37, 0.0  ;;  %v672_v41 = vpop.f32.mrb[4].mxu0  ;;  %v696_v42 = vpack.c.bf16 %v444_v32, %v443_v36 }
  0xf9   : > { %v446_v43 = vmin.f32 %v438_v39, 6.0  ;;  %v422_v44 = vadd.f32 %v672_v41, %v293_v35  ;;  %v416_v45 = vpop.f32.mrb[5].mxu0 }
  0xfa   : > { %v445_v46 = vmin.f32 %v437_v40, 6.0  ;;  %v417_v47 = vadd.f32 %v416_v45, %v288_v38  ;;  %697 = vmatpush3.bf16.msra.mxu1 %v696_v42 }
  0xfb   : > { %v440_v48 = vmax.f32 %v422_v44, 0.0  ;;  %698 = vmatprep.subr.bf16.mxu1 %v849_v19 }
  0xfc   : > { %v699_v50 = vpack.c.bf16 %v446_v43, %v445_v46  ;;  %v439_v51 = vmax.f32 %v417_v47, 0.0  ;;  %v675_v52 = vpop.f32.mrb[6].mxu0 }
  0xfd   : > { %v448_v54 = vmin.f32 %v440_v48, 6.0  ;;  %v432_v55 = vadd.f32 %v675_v52, %v303_v49  ;;  %v426_v56 = vpop.f32.mrb[7].mxu0 }
  0xfe   : > { %v447_v57 = vmin.f32 %v439_v51, 6.0  ;;  %v427_v58 = vadd.f32 %v426_v56, %v298_v53  ;;  %700 = vmatpush3.bf16.msra.mxu1 %v699_v50 }
  0xff   : > { %v442_v59 = vmax.f32 %v432_v55, 0.0  ;;  %701 = vmatprep.subr.bf16.mxu1 %v849_v19 }
 0x100   : > { %v702_v60 = vpack.c.bf16 %v448_v54, %v447_v57  ;;  %v441_v61 = vmax.f32 %v427_v58, 0.0 }
 0x101   : > { %v450_v62 = vmin.f32 %v442_v59, 6.0 }
 0x102   : > { %v449_v63 = vmin.f32 %v441_v61, 6.0  ;;  %703 = vmatpush3.bf16.msra.mxu1 %v702_v60 }
 0x103   : > { %704 = vmatprep.subr.bf16.mxu1 %v849_v19 }
 0x104   : > { %v705_v0 = vpack.c.bf16 %v450_v62, %v449_v63 }
 0x106   : > { %706 = vmatpush3.bf16.msra.mxu1 %v705_v0 }
 0x109   : > { %693 = vmatmul.mubr.msk.f32.vlgmr.msra.gmra.mrb[0].mxu1 %vm458_vm2, %v451_v1 }
 0x1dc   : > { %v528_v3 = vpop.f32.mrb[0].mxu1 }
 0x1dd   : > { %v529_v4 = vadd.f32 %v528_v3, %v456_v2  ;;  %v694_v5 = vpop.f32.mrb[1].mxu1 }
 0x1df   : > { %532 = vst [vmem:[%s239_s29] sm:$0xff] %v529_v4 }
 0x1e0   : > { %781 = shalt.err (!%p778_p5)
}
 0x1e1   : > { %s782_s15 = scalar_lea.hbm %s1010_s10, 128  ;;  %s786_s24 = scalar_lea.hbm %s1062_s5, 256 }
 0x1e2   : > { %p783_p6 = scmp.ne.s32.totalorder %s1010_s10, %s782_s15  ;;  %p787_p10 = scmp.lt.u32.totalorder %s1010_s10, %s1062_s5 }
 0x1e3   : > { %p788_p11 = scmp.lt.u32.totalorder %s786_s24, %s782_s15  ;;  %p790_p13 = scmp.lt.u32.totalorder %s782_s15, %s1010_s10 }
 0x1e4   : > { %p784_p7 = pnand %p783_p6, %p923_p4 }
 0x1e5   : > { %p789_p12 = por %p788_p11, %p787_p10 }
 0x1e6   : > { %p785_p9 = pneg %p784_p7 }
 0x1e7   : > { %p791_p0 = por %p790_p13, %p789_p12 }
 0x1e9   : > { %p792_p1 = pnand %p791_p0, %p785_p9 }
 0x1eb   : > { %795 = shalt.err (!%p792_p1)
}
 0x1ec   : > { %707 = dma.vmem_to_hbm [thread:$0]  (%p923_p4), %s1012_s7, 128, %s1010_s10, %s534_s11  }
 0x1ed PF: > { %p713_p2 = scmp.ge.s32.totalorder %s846_s23, 2  ;;  %s561_s29 = sand.u32 1, %s826_s18  }
 0x1ee   : > { %s562_s8 = scalar_lea.sflag [#allocation3], %s561_s29 }
 0x1ef   : > { %p710_p3 = pnand %p713_p2, %p930_p8 }
 0x1f1   : > { %821 = dma.done.wait (!%p710_p3), %s562_s8, 128  }
 0x1f2   : > { %823 = vsyncadd (!%p710_p3), %s562_s8, 4294967168  ;;  %s18_s23 = sadd.s32 1, %s846_s23   ;;  %s1065_s18 = smov %s830_s19 }
 0x1f3   : > { %p15_p5 = scmp.ge.s32.totalorder %s18_s23, 4   ;;  %s1066_s19 = smov %s834_s20 }
 0x1f4   : > { %s1067_s20 = smov %s936_s6  ;;  %s1068_s21 = smov %s842_s22 }
 0x1f5   : > { %s1069_s22 = smov %s1071_s26  ;;  %17 = sbr.rel (!%p15_p5) target bundleno = 4 (0x4), region = 75 }
 0x1fc   :  { %567 = vsyncpa [#allocation3], 1 }
 0x1fd   :  { %569 = vsyncpa [#allocation3 + $0x1], 1 }

</bundles_post_ra>
